<compile_context>
chip_gen: v5e
topology: v5e:2x2
jax: 0.10.0
libtpu: 0.0.40
codegen_flags: <defaults>
</compile_context>

<pallas_src>
import functools
import math

import jax
import jax.numpy as jnp
from jax.experimental import pallas as pl
from jax.experimental.pallas import tpu as pltpu


def _build_pe_table(max_len: int, d_model: int) -> jnp.ndarray:
    """Deterministic sinusoidal table, identical to the PyTorch __init__."""
    assert d_model % 2 == 0, "sinusoidal PE (like the PyTorch original) needs even d_model"
    position = jnp.arange(max_len, dtype=jnp.float32)[:, None]            # (max_len, 1)
    div_term = jnp.exp(
        jnp.arange(0, d_model, 2, dtype=jnp.float32) * (-math.log(10000.0) / d_model)
    )                                                                      # (d_model/2,)
    pe = jnp.zeros((max_len, d_model), dtype=jnp.float32)
    pe = pe.at[:, 0::2].set(jnp.sin(position * div_term))
    pe = pe.at[:, 1::2].set(jnp.cos(position * div_term))
    return pe                                                              # (max_len, d_model)


def _pos_enc_kernel(x_ref, pe_ref, o_ref, *, scale):
    # x_ref / o_ref: (tS, B, D) tiles;  pe_ref: (tS, D) f32 tile (de-duplicated).
    # Compute in f32, broadcast pe over the batch (sublane) dim, cast on store.
    x = x_ref[...].astype(jnp.float32) * scale          # (tS, B, D) f32
    pe = pe_ref[...][:, None, :]                        # (tS, 1, D) f32
    o_ref[...] = (x + pe).astype(o_ref.dtype)


def _round_up(v: int, m: int) -> int:
    return -(-v // m) * m


def positional_encoding(x: jnp.ndarray, pe_table: jnp.ndarray, d_model: int,
                        *, seq_tile: int | None = None) -> jnp.ndarray:
    """x: (seq_len, batch, d_model).  Returns same shape/dtype."""
    S, B, D = x.shape
    assert D == d_model
    assert d_model % 2 == 0
    assert S <= pe_table.shape[0], "seq_len exceeds max_len of the PE table"
    scale = math.sqrt(d_model)

    # De-duplicated PE stream: (S, D) f32, broadcast over batch inside the kernel.
    pe = pe_table[:S, :]

    # Conservative padded-VMEM estimate per seq row (layout pads (B, D) -> (>=8, >=128),
    # count 32-bit per element to stay dtype-safe).
    padded_B = max(8, _round_up(B, 8))
    padded_D = _round_up(D, 128)
    x_row_vmem = padded_B * padded_D * 4          # one seq step of an x (or y) tile
    pe_row_vmem = padded_D * 4                    # one seq step of the pe tile

    # Pick the seq tile so an x tile is ~4 MiB of padded VMEM (amortizes the
    # ~0.35 us/step grid overhead), rounded to a multiple of 8 rows (PE tile
    # sublane granularity; f32 PE -> 8 suffices for every x dtype).
    if seq_tile is None:
        target_tile_bytes = 4 * 1024 * 1024
        tS = max(8, (target_tile_bytes // x_row_vmem) // 8 * 8)
    else:
        tS = max(8, (int(seq_tile) // 8) * 8)
    if tS >= S:
        tS = S
    grid = (pl.cdiv(S, tS),)

    # VMEM budget: double-buffered x, y and pe tiles plus headroom; clamp so it
    # stays within v7x's 64 MiB physical VMEM (and v5e/v6e scoped budgets).
    vmem_needed = 2 * (2 * tS * x_row_vmem + _round_up(tS, 8) * pe_row_vmem) + (4 << 20)
    vmem_limit = int(min(max(vmem_needed, 32 << 20), 48 << 20))

    kernel = functools.partial(_pos_enc_kernel, scale=scale)

    out = pl.pallas_call(
        kernel,
        out_shape=jax.ShapeDtypeStruct((S, B, D), x.dtype),
        grid=grid,
        in_specs=[
            pl.BlockSpec((tS, B, D), lambda i: (i, 0, 0)),   # x tile (full B, D)
            pl.BlockSpec((tS, D), lambda i: (i, 0)),         # pe tile (no batch replication)
        ],
        out_specs=pl.BlockSpec((tS, B, D), lambda i: (i, 0, 0)),
        compiler_params=pltpu.CompilerParams(
            dimension_semantics=("parallel",),               # independent seq blocks
            vmem_limit_bytes=vmem_limit,
        ),
    )(x, pe)

    return out


if __name__ == "__main__":
    max_len = 42
    d_model = 32
    batch = 2

    key = jax.random.PRNGKey(0)
    pe_table = _build_pe_table(max_len, d_model)
    scale = math.sqrt(d_model)

    # Case 1: seq=8, batch=2, d_model=32 (single grid step), f32.
    seq_len = 8
    x1 = jax.random.normal(jax.random.fold_in(key, 0), (seq_len, batch, d_model),
                           dtype=jnp.float32)
    y1 = jax.block_until_ready(positional_encoding(x1, pe_table, d_model))
    ref1 = x1 * scale + pe_table[:seq_len, None, :]
    assert y1.shape == (seq_len, batch, d_model)
    assert jnp.allclose(y1, ref1, atol=1e-5, rtol=1e-5)

    # Case 2: seq=40 with explicit seq_tile=16 -> multi-step pipelined grid with
    # a ragged final block (exercises the general tiling path), f32.
    seq_len2 = 40
    x2 = jax.random.normal(jax.random.fold_in(key, 1), (seq_len2, batch, d_model),
                           dtype=jnp.float32)
    y2 = jax.block_until_ready(positional_encoding(x2, pe_table, d_model, seq_tile=16))
    ref2 = x2 * scale + pe_table[:seq_len2, None, :]
    assert y2.shape == (seq_len2, batch, d_model)
    assert jnp.allclose(y2, ref2, atol=1e-5, rtol=1e-5)

    # Case 3: bf16 input -- verifies the explicit f32 compute path + cast on store.
    x3 = jax.random.normal(jax.random.fold_in(key, 2), (seq_len2, batch, d_model),
                           dtype=jnp.float32).astype(jnp.bfloat16)
    y3 = jax.block_until_ready(positional_encoding(x3, pe_table, d_model, seq_tile=16))
    ref3 = (x3.astype(jnp.float32) * scale + pe_table[:seq_len2, None, :]).astype(jnp.bfloat16)
    assert y3.shape == (seq_len2, batch, d_model)
    assert y3.dtype == jnp.bfloat16
    assert jnp.allclose(y3.astype(jnp.float32), ref3.astype(jnp.float32), atol=1e-2, rtol=1e-2)

    print("KERNEL_OK")
</pallas_src>

<mosaic_0001>
module attributes {stable_mosaic.version = 11 : i64} {
  func.func @_pos_enc_kernel(%arg0: i32, %arg1: memref<8x2x32xf32, #tpu.memory_space<vmem>>, %arg2: memref<8x32xf32, #tpu.memory_space<vmem>>, %arg3: memref<8x2x32xf32, #tpu.memory_space<vmem>>) attributes {dimension_semantics = [#tpu.dimension_semantics<parallel>], iteration_bounds = array<i64: 1>, scalar_prefetch = 0 : i64, scratch_operands = 0 : i64, tpu.core_type = #tpu.core_type<tc>, window_params = [{transform_indices = @transform_0, window_bounds = array<i64: 8, 2, 32>}, {transform_indices = @transform_1, window_bounds = array<i64: 8, 32>}, {transform_indices = @transform_2, window_bounds = array<i64: 8, 2, 32>}]} {
    %c0 = arith.constant 0 : index
    %c0_0 = arith.constant 0 : index
    %c0_1 = arith.constant 0 : index
    %0 = vector.load %arg1[%c0, %c0_0, %c0_1] : memref<8x2x32xf32, #tpu.memory_space<vmem>>, vector<8x2x32xf32>
    %cst = arith.constant 5.65685415 : f32
    %1 = vector.broadcast %cst : f32 to vector<8x2x32xf32>
    %2 = arith.mulf %0, %1 : vector<8x2x32xf32>
    %c0_2 = arith.constant 0 : index
    %c0_3 = arith.constant 0 : index
    %3 = vector.load %arg2[%c0_2, %c0_3] : memref<8x32xf32, #tpu.memory_space<vmem>>, vector<8x32xf32>
    %4 = vector.shape_cast %3 : vector<8x32xf32> to vector<8x1x32xf32>
    %5 = vector.broadcast %4 : vector<8x1x32xf32> to vector<8x2x32xf32>
    %6 = arith.addf %2, %5 : vector<8x2x32xf32>
    %c0_4 = arith.constant 0 : index
    %c0_5 = arith.constant 0 : index
    %c0_6 = arith.constant 0 : index
    %7 = vector.load %arg3[%c0_4, %c0_5, %c0_6] : memref<8x2x32xf32, #tpu.memory_space<vmem>>, vector<8x2x32xf32>
    tpu.vector_store %arg3[%c0_4, %c0_5, %c0_6], %6 {strides = array<i32>} : memref<8x2x32xf32, #tpu.memory_space<vmem>>, vector<8x2x32xf32>,
    return
  }
  func.func @transform_0(%arg0: i32) -> (i32, i32, i32) {
    %c0_i32 = arith.constant 0 : i32
    %c0_i32_0 = arith.constant 0 : i32
    %c0_i32_1 = arith.constant 0 : i32
    return %arg0, %c0_i32, %c0_i32_0 : i32, i32, i32
  }
  func.func @transform_1(%arg0: i32) -> (i32, i32) {
    %c0_i32 = arith.constant 0 : i32
    %c0_i32_0 = arith.constant 0 : i32
    return %arg0, %c0_i32 : i32, i32
  }
  func.func @transform_2(%arg0: i32) -> (i32, i32, i32) {
    %c0_i32 = arith.constant 0 : i32
    %c0_i32_0 = arith.constant 0 : i32
    %c0_i32_1 = arith.constant 0 : i32
    return %arg0, %c0_i32, %c0_i32_0 : i32, i32, i32
  }
}

</mosaic_0001>

<bundles_post_ra>
// kernel: tpu_custom_call.1
= control target key start
LH: loop header
LB: loop body
LE: loop exit
PB: predicated region body
PF: predicated region fallthrough
CT: control target
= control target key end

     0   :  { %7 = vsyncpa [#allocation3], 0  ;;  %s246_s0 = inlined_call_operand.hbm [shape: f32[8,2,32], index: 0, kind: input, shape index: {}]   ;;  %s247_s1 = inlined_call_operand.hbm [shape: f32[8,32], index: 1, kind: input, shape index: {}]   ;;  %s248_s2 = inlined_call_operand.hbm [shape: f32[8,2,32], index: 2, kind: output, shape index: {}]  }
   0x1   :  { %8 = vsyncpa [#allocation6], 0 }
   0x2   :  { %9 = vsyncpa [#allocation4], 0  ;;  %s14_s11 = sshll.u32 %s246_s0, 4  ;;  %s203_s12 = smov [#allocation2]   ;;  %s15_s11 = int_to_ptr.hbm [resolvable:$true] %s14_s11 }
   0x3   :  { %s16_s13 = sshll.u32 %s203_s12, 4  ;;  %s28_s16 = sshll.u32 %s247_s1, 4  ;;  %s17_s13 = int_to_ptr.vmem [resolvable:$true] %s16_s13  ;;  %s29_s16 = int_to_ptr.hbm [resolvable:$true] %s28_s16 }
   0x4   :  { %s204_s17 = smov 32   ;;  %s205_s18 = smov 2  }
   0x5   :  { %22 = dma.hbm_to_vmem [thread:$0]  %s15_s11, 256, %s17_s13, [#allocation3], %s204_s17, %s204_s17, %s205_s18  }
   0x6   :  { %s206_s19 = smov [#allocation5]  }
   0x7   :  { %s30_s20 = sshll.u32 %s206_s19, 4  ;;  %s31_s20 = int_to_ptr.vmem [resolvable:$true] %s30_s20 }
   0x8   :  { %33 = dma.hbm_to_vmem [thread:$0]  %s29_s16, 128, %s31_s20, [#allocation6]  }
   0x9   :  { %197 = dma.done.wait [#allocation3], 256  }
   0xa   :  { %198 = vsyncadd [#allocation3], 4294967040 }
   0xb   :  { %199 = dma.done.wait [#allocation6], 128  }
   0xc   :  { %200 = vsyncadd [#allocation6], 4294967168  ;;  %v42_v0 = vld [vmem:[#allocation2] sm:$0x3]  ;;  %v58_v1 = vld [vmem:[#allocation5] sm:$0xff]  ;;  %vm91_vm0 = vcmask 254976  }
   0xd   :  { %v43_v2 = vld [vmem:[#allocation2 + $0x2] sm:$0x3]  ;;  %v50_v3 = vmul.f32 5.656854, %v42_v0  ;;  %v67_v4 = vperm.slane %v58_v1, 0  ;;  %v60_v6 = vrot.slane %v58_v1, 1 }
   0xe   :  { %v51_v5 = vmul.f32 5.656854, %v43_v2  ;;  %v44_v7 = vld [vmem:[#allocation2 + $0x4] sm:$0x3]  ;;  %v61_v8 = vrot.slane %v58_v1, 2  ;;  %v62_v10 = vrot.slane %v58_v1, 3 }
   0xf   :  { %v45_v9 = vld [vmem:[#allocation2 + $0x6] sm:$0x3]  ;;  %v83_v11 = vadd.f32 %v67_v4, %v50_v3  ;;  %v68_v12 = vperm.slane %v60_v6, 0  ;;  %v52_v13 = vmul.f32 5.656854, %v44_v7  ;;  %v63_v18 = vrot.slane %v58_v1, 4 }
  0x10   :  { %v53_v14 = vmul.f32 5.656854, %v45_v9  ;;  %v69_v15 = vperm.slane %v61_v8, 0  ;;  %v70_v16 = vperm.slane %v62_v10, 0  ;;  %v46_v17 = vld [vmem:[#allocation2 + $0x8] sm:$0x3] }
  0x11   :  { %v64_v19 = vrot.slane %v58_v1, 5  ;;  %92 = vst.msk [vmem:[#allocation7] sm:$0x3] %vm91_vm0, %v83_v11  ;;  %v84_v20 = vadd.f32 %v68_v12, %v51_v5  ;;  %v54_v21 = vmul.f32 5.656854, %v46_v17  ;;  %v71_v25 = vperm.slane %v63_v18, 0 }
  0x12   :  { %v47_v22 = vld [vmem:[#allocation2 + $0xa] sm:$0x3]  ;;  %v85_v23 = vadd.f32 %v69_v15, %v52_v13  ;;  %v86_v24 = vadd.f32 %v70_v16, %v53_v14  ;;  %v48_v27 = vld [vmem:[#allocation2 + $0xc] sm:$0x3]  ;;  %v65_v30 = vrot.slane %v58_v1, 6  ;;  %v66_v33 = vrot.slane %v58_v1, 7 }
  0x13   :  { %v55_v26 = vmul.f32 5.656854, %v47_v22  ;;  %93 = vst.msk [vmem:[#allocation7 + $0x2] sm:$0x3] %vm91_vm0, %v84_v20  ;;  %v72_v28 = vperm.slane %v64_v19, 0  ;;  %v87_v31 = vadd.f32 %v71_v25, %v54_v21  ;;  %s106_s21 = sshll.u32 %s248_s2, 4  ;;  %s107_s21 = int_to_ptr.hbm [resolvable:$true] %s106_s21 }
  0x14   :  { %v56_v29 = vmul.f32 5.656854, %v48_v27  ;;  %94 = vst.msk [vmem:[#allocation7 + $0x4] sm:$0x3] %vm91_vm0, %v85_v23  ;;  %v49_v32 = vld [vmem:[#allocation2 + $0xe] sm:$0x3] }
  0x15   :  { %95 = vst.msk [vmem:[#allocation7 + $0x6] sm:$0x3] %vm91_vm0, %v86_v24  ;;  %v88_v34 = vadd.f32 %v72_v28, %v55_v26  ;;  %v73_v35 = vperm.slane %v65_v30, 0  ;;  %v57_v36 = vmul.f32 5.656854, %v49_v32  ;;  %s207_s22 = smov [#allocation7]  }
  0x16   :  { %s104_s23 = sshll.u32 %s207_s22, 4  ;;  %96 = vst.msk [vmem:[#allocation7 + $0x8] sm:$0x3] %vm91_vm0, %v87_v31  ;;  %v74_v37 = vperm.slane %v66_v33, 0  ;;  %s105_s23 = int_to_ptr.vmem [resolvable:$true] %s104_s23 }
  0x17   :  { %97 = vst.msk [vmem:[#allocation7 + $0xa] sm:$0x3] %vm91_vm0, %v88_v34  ;;  %v89_v38 = vadd.f32 %v73_v35, %v56_v29 }
  0x18   :  { %v90_v39 = vadd.f32 %v74_v37, %v57_v36 }
  0x19   :  { %98 = vst.msk [vmem:[#allocation7 + $0xc] sm:$0x3] %vm91_vm0, %v89_v38 }
  0x1a   :  { %99 = vst.msk [vmem:[#allocation7 + $0xe] sm:$0x3] %vm91_vm0, %v90_v39 }
  0x1b   :  { %112 = dma.vmem_to_hbm [thread:$0]  %s105_s23, 256, %s107_s21, [#allocation4], %s204_s17, %s204_s17, %s205_s18  }
  0x1c   :  { %201 = dma.done.wait [#allocation4], 256  }
  0x1d   :  { %202 = vsyncadd [#allocation4], 4294967040 }
  0x1e   :  { %117 = vsyncpa [#allocation3], 1 }
  0x1f   :  { %118 = vsyncpa [#allocation6], 1 }
  0x20   :  { %119 = vsyncpa [#allocation4], 1 }

</bundles_post_ra>
